<compile_context>
chip_gen: v7x
topology: tpu7x:2x2x1
jax: 0.10.0
libtpu: 0.0.40
codegen_flags: <defaults>
</compile_context>

<pallas_src>
import numpy as np
import jax
import jax.numpy as jnp
from jax import lax
from jax.experimental import pallas as pl
from jax.experimental.pallas import tpu as pltpu


# ---------------------------------------------------------------------------
# Fused MLP + GRU input-projection kernel:
#   Linear(E->H) -> ReLU -> Linear(H->H) -> [dropout eval identity] -> @ [W_ih_f | W_ih_b]^T
# One batched matmul chain over all T*B tokens, tiled over the token dimension.
# TODO(synk): the `MLP` class is not defined in the provided source; assumed the canonical
#             Linear -> ReLU -> Linear with the given (input, hidden, output) dims.
# ---------------------------------------------------------------------------
def mlp_proj_kernel(x_ref, w1_ref, b1_ref, w2_ref, b2_ref, wih_ref, bih_ref, gi_ref):
    h = jnp.dot(x_ref[...], w1_ref[...], preferred_element_type=jnp.float32) + b1_ref[...]
    h = jnp.maximum(h, 0.0)
    m = jnp.dot(h, w2_ref[...], preferred_element_type=jnp.float32) + b2_ref[...]
    # TODO(synk): training-mode Dropout(0.2) (random masking + 1/0.8 rescale) not implemented;
    #             eval-mode identity here.
    gi = jnp.dot(m, wih_ref[...], preferred_element_type=jnp.float32) + bih_ref[...]
    gi_ref[...] = gi.astype(gi_ref.dtype)


def _choose_token_block(n):
    for blk in (512, 256, 128, 64, 32, 16, 8):
        if n % blk == 0:
            return blk
    return n  # tiny inputs: single full block


def mlp_proj_forward(x2d, w1, b1, w2, b2, wih_all, bih_all):
    """x2d: [N, E] tokens; returns gi_all: [N, 6H] (fwd r,z,n | bwd r,z,n)."""
    n, e = x2d.shape
    h_mid = w1.shape[1]
    h_out = w2.shape[1]
    six_h = wih_all.shape[1]
    tok_blk = _choose_token_block(n)
    const = lambda i: (0, 0)
    return pl.pallas_call(
        mlp_proj_kernel,
        out_shape=jax.ShapeDtypeStruct((n, six_h), jnp.float32),
        grid=(n // tok_blk,),
        in_specs=[
            pl.BlockSpec((tok_blk, e), lambda i: (i, 0)),   # tokens
            pl.BlockSpec((e, h_mid), const),                # W1
            pl.BlockSpec((1, h_mid), const),                # b1
            pl.BlockSpec((h_mid, h_out), const),            # W2
            pl.BlockSpec((1, h_out), const),                # b2
            pl.BlockSpec((h_out, six_h), const),            # [W_ih_f^T | W_ih_b^T]
            pl.BlockSpec((1, six_h), const),                # [b_ih_f | b_ih_b]
        ],
        out_specs=pl.BlockSpec((tok_blk, six_h), lambda i: (i, 0)),
        compiler_params=pltpu.CompilerParams(dimension_semantics=("parallel",)),
    )(x2d, w1, b1.reshape(1, -1), w2, b2.reshape(1, -1), wih_all, bih_all.reshape(1, -1))


# ---------------------------------------------------------------------------
# Fused bidirectional GRU recurrence: a single kernel (no grid) running the whole
# time loop with lax.fori_loop (unrolled for small T). Packed-sequence semantics are
# reproduced with a per-step (B,1) mask built in-kernel from the lengths:
#   - padded steps keep the previous hidden state,
#   - padded output positions are 0 (pad_packed_sequence behavior),
#   - final hidden therefore equals the hidden at each sequence's last valid step.
# Forward/backward steps are interleaved in the same loop iteration (independent chains
# -> better MXU/VPU overlap). Per-direction step outputs go to VMEM scratch and the
# lane-dense [T, B, 2H] output is written once at the end.
# ---------------------------------------------------------------------------
def bigru_kernel(gi_ref, lens_ref, whh_f_ref, whh_b_ref, bhh_f_ref, bhh_b_ref,
                 out_ref, hlast_ref, outf_scr, outb_scr):
    T, B, _ = gi_ref.shape
    H = whh_f_ref.shape[0]

    lens = lens_ref[...]        # (B, 1) int32
    whh_f = whh_f_ref[...]      # (H, 3H)
    whh_b = whh_b_ref[...]      # (H, 3H)
    bhh_f = bhh_f_ref[...]      # (1, 3H)
    bhh_b = bhh_b_ref[...]      # (1, 3H)
    zero = jnp.zeros((B, H), jnp.float32)

    def gru_cell(gi, h_prev, whh, bhh):
        # gi: precomputed x @ W_ih^T + b_ih for this step/direction, gate order (r, z, n).
        gh = jnp.dot(h_prev, whh, preferred_element_type=jnp.float32) + bhh
        r = jax.nn.sigmoid(gi[:, :H] + gh[:, :H])
        z = jax.nn.sigmoid(gi[:, H:2 * H] + gh[:, H:2 * H])
        n = jnp.tanh(gi[:, 2 * H:] + r * gh[:, 2 * H:])
        return (1.0 - z) * n + z * h_prev

    def step(i, carry):
        h_f, h_b = carry
        tb = T - 1 - i

        gi_fwd = gi_ref[i]      # (B, 6H)
        gi_bwd = gi_ref[tb]     # (B, 6H)

        # forward direction processes timestep i
        hf_new = gru_cell(gi_fwd[:, :3 * H], h_f, whh_f, bhh_f)
        m_f = i < lens          # (B, 1) bool
        outf_scr[i] = jnp.where(m_f, hf_new, zero)
        h_f = jnp.where(m_f, hf_new, h_f)

        # backward direction processes timestep T-1-i
        hb_new = gru_cell(gi_bwd[:, 3 * H:], h_b, whh_b, bhh_b)
        m_b = tb < lens
        outb_scr[tb] = jnp.where(m_b, hb_new, zero)
        h_b = jnp.where(m_b, hb_new, h_b)
        return (h_f, h_b)

    h_f, h_b = lax.fori_loop(0, T, step, (zero, zero), unroll=True)

    # single lane-dense write of the concatenated [T, B, 2H] output
    out_ref[:, :, :H] = outf_scr[...]
    out_ref[:, :, H:] = outb_scr[...]
    # final hiddens written once, after the loop
    hlast_ref[0] = h_f
    hlast_ref[1] = h_b


def bigru_forward(gi_all, lens_b1, w_hh_f, w_hh_b, b_hh_f, b_hh_b):
    """gi_all: [T, B, 6H]; lens_b1: [B, 1] int32. Returns ([T, B, 2H], [2, B, H])."""
    T, B, _ = gi_all.shape
    H = w_hh_f.shape[0]
    # TODO(synk): whole gi/out kept VMEM-resident (fine at these sizes); for long T / large B*H
    #             stream gi by T-chunks and budget against 64 MiB VMEM on v7x.
    return pl.pallas_call(
        bigru_kernel,
        out_shape=(jax.ShapeDtypeStruct((T, B, 2 * H), jnp.float32),
                   jax.ShapeDtypeStruct((2, B, H), jnp.float32)),
        scratch_shapes=[pltpu.VMEM((T, B, H), jnp.float32),
                        pltpu.VMEM((T, B, H), jnp.float32)],
    )(gi_all, lens_b1, w_hh_f, w_hh_b, b_hh_f.reshape(1, -1), b_hh_b.reshape(1, -1))


# ---------------------------------------------------------------------------
# PackRNN forward (glue + kernels)
# ---------------------------------------------------------------------------
def pack_rnn_forward(params, x_ids, in_len):
    """x_ids: [B, T] int32; in_len: int array sorted descending (pack_padded_sequence)."""
    B, T = x_ids.shape
    E = params["embed"].shape[1]
    H = params["w_hh_f"].shape[0]

    # 1) embedding lookup (gather), produced directly in time-major [T, B, E].
    emb_tbe = jnp.take(params["embed"], x_ids.T, axis=0)                  # [T, B, E]

    # 2+3) fused MLP + dropout(eval identity) + input-to-hidden projections (both directions).
    wih_all = jnp.concatenate([params["w_ih_f"], params["w_ih_b"]], axis=1)   # [H, 6H]
    bih_all = jnp.concatenate([params["b_ih_f"], params["b_ih_b"]], axis=0)   # [6H]
    gi_all = mlp_proj_forward(emb_tbe.reshape(T * B, E),
                              params["mlp_w1"], params["mlp_b1"],
                              params["mlp_w2"], params["mlp_b2"],
                              wih_all, bih_all).reshape(T, B, 6 * H)

    # 4) packed bidirectional GRU: single fused kernel, lengths -> in-kernel mask.
    lens_np = np.asarray(in_len)
    lens_b1 = jnp.asarray(lens_np, dtype=jnp.int32).reshape(B, 1)
    out_tb, h = bigru_forward(gi_all, lens_b1,
                              params["w_hh_f"], params["w_hh_b"],
                              params["b_hh_f"], params["b_hh_b"])

    t_out = int(lens_np.max())
    out = jnp.transpose(out_tb, (1, 0, 2))[:, :t_out]                     # [B, T_out, 2H]
    return out, h                                                          # h: [2, B, H]


# ---------------------------------------------------------------------------
# Pure-JAX reference (correctness sanity check)
# ---------------------------------------------------------------------------
def _ref_gru_dir(x_tbe, lens, w_ih_t, w_hh_t, b_ih, b_hh, reverse):
    T, B, _ = x_tbe.shape
    H = w_hh_t.shape[0]
    h = jnp.zeros((B, H), jnp.float32)
    outs = [None] * T
    order = range(T - 1, -1, -1) if reverse else range(T)
    for t in order:
        m = (t < lens).astype(jnp.float32)[:, None]
        gi = x_tbe[t] @ w_ih_t + b_ih
        gh = h @ w_hh_t + b_hh
        r = jax.nn.sigmoid(gi[:, :H] + gh[:, :H])
        z = jax.nn.sigmoid(gi[:, H:2 * H] + gh[:, H:2 * H])
        n = jnp.tanh(gi[:, 2 * H:] + r * gh[:, 2 * H:])
        h_new = (1.0 - z) * n + z * h
        outs[t] = m * h_new
        h = m * h_new + (1.0 - m) * h
    return jnp.stack(outs, 0), h


def _ref_forward(params, x_ids, in_len):
    B, T = x_ids.shape
    E = params["embed"].shape[1]
    H = params["w_hh_f"].shape[0]
    emb = jnp.take(params["embed"], x_ids, axis=0)
    hmid = jnp.maximum(emb.reshape(B * T, E) @ params["mlp_w1"] + params["mlp_b1"], 0.0)
    mlp_out = (hmid @ params["mlp_w2"] + params["mlp_b2"]).reshape(B, T, H)
    x_tbe = jnp.transpose(mlp_out, (1, 0, 2))
    lens = jnp.asarray(np.asarray(in_len))
    of, hf = _ref_gru_dir(x_tbe, lens, params["w_ih_f"], params["w_hh_f"],
                          params["b_ih_f"], params["b_hh_f"], False)
    ob, hb = _ref_gru_dir(x_tbe, lens, params["w_ih_b"], params["w_hh_b"],
                          params["b_ih_b"], params["b_hh_b"], True)
    out = jnp.transpose(jnp.concatenate([of, ob], -1), (1, 0, 2))[:, :int(np.max(in_len))]
    return out, jnp.stack([hf, hb], 0)


if __name__ == "__main__":
    vocab_size, embed_size, hidden_size = 50, 32, 32      # embed_size == hidden_size (see NOTE)
    B, T = 2, 8
    in_len = np.array([8, 5], dtype=np.int32)              # sorted descending (enforce_sorted=True)

    key = jax.random.PRNGKey(0)
    ks = jax.random.split(key, 16)
    E, H = embed_size, hidden_size

    def rnd(k, shape, scale=0.1):
        return scale * jax.random.normal(k, shape, jnp.float32)

    params = {
        "embed": rnd(ks[0], (vocab_size, E)),
        "mlp_w1": rnd(ks[1], (E, H)),
        "mlp_b1": rnd(ks[2], (H,)),
        "mlp_w2": rnd(ks[3], (H, H)),
        "mlp_b2": rnd(ks[4], (H,)),
        # GRU weights stored transposed ([in, 3H]) for right-multiplication; gate order (r, z, n).
        "w_ih_f": rnd(ks[5], (H, 3 * H)),
        "w_hh_f": rnd(ks[6], (H, 3 * H)),
        "b_ih_f": rnd(ks[7], (3 * H,)),
        "b_hh_f": rnd(ks[8], (3 * H,)),
        "w_ih_b": rnd(ks[9], (H, 3 * H)),
        "w_hh_b": rnd(ks[10], (H, 3 * H)),
        "b_ih_b": rnd(ks[11], (3 * H,)),
        "b_hh_b": rnd(ks[12], (3 * H,)),
    }
    x_ids = jax.random.randint(ks[13], (B, T), 0, vocab_size, dtype=jnp.int32)

    out, h = pack_rnn_forward(params, x_ids, in_len)
    (out, h) = jax.block_until_ready((out, h))

    assert out.shape == (B, int(in_len.max()), 2 * H), out.shape
    assert h.shape == (2, B, H), h.shape

    # sanity check against a pure-JAX reference
    out_ref, h_ref = _ref_forward(params, x_ids, in_len)
    np.testing.assert_allclose(np.asarray(out), np.asarray(out_ref), rtol=2e-3, atol=2e-3)
    np.testing.assert_allclose(np.asarray(h), np.asarray(h_ref), rtol=2e-3, atol=2e-3)

    print("KERNEL_OK")
</pallas_src>

<mosaic_0001>
module attributes {stable_mosaic.version = 11 : i64} {
  func.func @mlp_proj_kernel(%arg0: i32, %arg1: memref<16x32xf32, #tpu.memory_space<vmem>>, %arg2: memref<32x32xf32, #tpu.memory_space<vmem>>, %arg3: memref<1x32xf32, #tpu.memory_space<vmem>>, %arg4: memref<32x32xf32, #tpu.memory_space<vmem>>, %arg5: memref<1x32xf32, #tpu.memory_space<vmem>>, %arg6: memref<32x192xf32, #tpu.memory_space<vmem>>, %arg7: memref<1x192xf32, #tpu.memory_space<vmem>>, %arg8: memref<16x192xf32, #tpu.memory_space<vmem>>) attributes {dimension_semantics = [#tpu.dimension_semantics<parallel>], iteration_bounds = array<i64: 1>, scalar_prefetch = 0 : i64, scratch_operands = 0 : i64, tpu.core_type = #tpu.core_type<tc>, window_params = [{transform_indices = @transform_0, window_bounds = array<i64: 16, 32>}, {pipeline_mode = #tpu.pipeline_mode<synchronous>, transform_indices = @transform_1, window_bounds = array<i64: 32, 32>}, {pipeline_mode = #tpu.pipeline_mode<synchronous>, transform_indices = @transform_2, window_bounds = array<i64: 1, 32>}, {pipeline_mode = #tpu.pipeline_mode<synchronous>, transform_indices = @transform_3, window_bounds = array<i64: 32, 32>}, {pipeline_mode = #tpu.pipeline_mode<synchronous>, transform_indices = @transform_4, window_bounds = array<i64: 1, 32>}, {pipeline_mode = #tpu.pipeline_mode<synchronous>, transform_indices = @transform_5, window_bounds = array<i64: 32, 192>}, {pipeline_mode = #tpu.pipeline_mode<synchronous>, transform_indices = @transform_6, window_bounds = array<i64: 1, 192>}, {transform_indices = @transform_7, window_bounds = array<i64: 16, 192>}]} {
    %c0 = arith.constant 0 : index
    %c0_0 = arith.constant 0 : index
    %0 = vector.load %arg1[%c0, %c0_0] : memref<16x32xf32, #tpu.memory_space<vmem>>, vector<16x32xf32>
    %c0_1 = arith.constant 0 : index
    %c0_2 = arith.constant 0 : index
    %1 = vector.load %arg2[%c0_1, %c0_2] : memref<32x32xf32, #tpu.memory_space<vmem>>, vector<32x32xf32>
    %cst = arith.constant dense<0.000000e+00> : vector<16x32xf32>
    %2 = tpu.matmul %0, %1, %cst {dimension_numbers = #tpu.dot_dimension_numbers<[1], [0], [0], [1], [0, 0, 1, 1], [], []>} : vector<16x32xf32>, vector<32x32xf32>, vector<16x32xf32> -> vector<16x32xf32>
    %c0_3 = arith.constant 0 : index
    %c0_4 = arith.constant 0 : index
    %3 = vector.load %arg3[%c0_3, %c0_4] : memref<1x32xf32, #tpu.memory_space<vmem>>, vector<1x32xf32>
    %4 = vector.broadcast %3 : vector<1x32xf32> to vector<16x32xf32>
    %5 = arith.addf %2, %4 : vector<16x32xf32>
    %cst_5 = arith.constant 0.000000e+00 : f32
    %6 = vector.broadcast %cst_5 : f32 to vector<16x32xf32>
    %7 = arith.maximumf %5, %6 : vector<16x32xf32>
    %c0_6 = arith.constant 0 : index
    %c0_7 = arith.constant 0 : index
    %8 = vector.load %arg4[%c0_6, %c0_7] : memref<32x32xf32, #tpu.memory_space<vmem>>, vector<32x32xf32>
    %cst_8 = arith.constant dense<0.000000e+00> : vector<16x32xf32>
    %9 = tpu.matmul %7, %8, %cst_8 {dimension_numbers = #tpu.dot_dimension_numbers<[1], [0], [0], [1], [0, 0, 1, 1], [], []>} : vector<16x32xf32>, vector<32x32xf32>, vector<16x32xf32> -> vector<16x32xf32>
    %c0_9 = arith.constant 0 : index
    %c0_10 = arith.constant 0 : index
    %10 = vector.load %arg5[%c0_9, %c0_10] : memref<1x32xf32, #tpu.memory_space<vmem>>, vector<1x32xf32>
    %11 = vector.broadcast %10 : vector<1x32xf32> to vector<16x32xf32>
    %12 = arith.addf %9, %11 : vector<16x32xf32>
    %c0_11 = arith.constant 0 : index
    %c0_12 = arith.constant 0 : index
    %13 = vector.load %arg6[%c0_11, %c0_12] : memref<32x192xf32, #tpu.memory_space<vmem>>, vector<32x192xf32>
    %cst_13 = arith.constant dense<0.000000e+00> : vector<16x192xf32>
    %14 = tpu.matmul %12, %13, %cst_13 {dimension_numbers = #tpu.dot_dimension_numbers<[1], [0], [0], [1], [0, 0, 1, 1], [], []>} : vector<16x32xf32>, vector<32x192xf32>, vector<16x192xf32> -> vector<16x192xf32>
    %c0_14 = arith.constant 0 : index
    %c0_15 = arith.constant 0 : index
    %15 = vector.load %arg7[%c0_14, %c0_15] : memref<1x192xf32, #tpu.memory_space<vmem>>, vector<1x192xf32>
    %16 = vector.broadcast %15 : vector<1x192xf32> to vector<16x192xf32>
    %17 = arith.addf %14, %16 : vector<16x192xf32>
    %c0_16 = arith.constant 0 : index
    %c0_17 = arith.constant 0 : index
    %18 = vector.load %arg8[%c0_16, %c0_17] : memref<16x192xf32, #tpu.memory_space<vmem>>, vector<16x192xf32>
    tpu.vector_store %arg8[%c0_16, %c0_17], %17 {strides = array<i32>} : memref<16x192xf32, #tpu.memory_space<vmem>>, vector<16x192xf32>,
    return
  }
  func.func @transform_0(%arg0: i32) -> (i32, i32) {
    %c0_i32 = arith.constant 0 : i32
    %c0_i32_0 = arith.constant 0 : i32
    return %arg0, %c0_i32 : i32, i32
  }
  func.func @transform_1(%arg0: i32) -> (i32, i32) {
    %c0_i32 = arith.constant 0 : i32
    %c0_i32_0 = arith.constant 0 : i32
    %c0_i32_1 = arith.constant 0 : i32
    return %c0_i32, %c0_i32_0 : i32, i32
  }
  func.func @transform_2(%arg0: i32) -> (i32, i32) {
    %c0_i32 = arith.constant 0 : i32
    %c0_i32_0 = arith.constant 0 : i32
    %c0_i32_1 = arith.constant 0 : i32
    return %c0_i32, %c0_i32_0 : i32, i32
  }
  func.func @transform_3(%arg0: i32) -> (i32, i32) {
    %c0_i32 = arith.constant 0 : i32
    %c0_i32_0 = arith.constant 0 : i32
    %c0_i32_1 = arith.constant 0 : i32
    return %c0_i32, %c0_i32_0 : i32, i32
  }
  func.func @transform_4(%arg0: i32) -> (i32, i32) {
    %c0_i32 = arith.constant 0 : i32
    %c0_i32_0 = arith.constant 0 : i32
    %c0_i32_1 = arith.constant 0 : i32
    return %c0_i32, %c0_i32_0 : i32, i32
  }
  func.func @transform_5(%arg0: i32) -> (i32, i32) {
    %c0_i32 = arith.constant 0 : i32
    %c0_i32_0 = arith.constant 0 : i32
    %c0_i32_1 = arith.constant 0 : i32
    return %c0_i32, %c0_i32_0 : i32, i32
  }
  func.func @transform_6(%arg0: i32) -> (i32, i32) {
    %c0_i32 = arith.constant 0 : i32
    %c0_i32_0 = arith.constant 0 : i32
    %c0_i32_1 = arith.constant 0 : i32
    return %c0_i32, %c0_i32_0 : i32, i32
  }
  func.func @transform_7(%arg0: i32) -> (i32, i32) {
    %c0_i32 = arith.constant 0 : i32
    %c0_i32_0 = arith.constant 0 : i32
    return %arg0, %c0_i32 : i32, i32
  }
}

</mosaic_0001>

<bundles_post_ra>
// kernel: tpu_custom_call.1
= control target key start
LH: loop header
LB: loop body
LE: loop exit
PB: predicated region body
PF: predicated region fallthrough
CT: control target
= control target key end

     0   :  { %12 = vsyncpa [#allocation3], 0  ;;  %s746_s0 = inlined_call_operand.hbm [shape: f32[16,32], index: 0, kind: input, shape index: {}]   ;;  %s747_s1 = inlined_call_operand.hbm [shape: f32[32,32], index: 1, kind: input, shape index: {}]   ;;  %s748_s2 = inlined_call_operand.vmem [shape: f32[1,32], index: 2, kind: input, shape index: {}]   ;;  %s749_s3 = inlined_call_operand.hbm [shape: f32[32,32], index: 3, kind: input, shape index: {}]   ;;  %s750_s4 = inlined_call_operand.vmem [shape: f32[1,32], index: 4, kind: input, shape index: {}]   ;;  %s751_s5 = inlined_call_operand.hbm [shape: f32[32,192], index: 5, kind: input, shape index: {}]   ;;  %s752_s6 = inlined_call_operand.vmem [shape: f32[1,192], index: 6, kind: input, shape index: {}]   ;;  %s753_s7 = inlined_call_operand.hbm [shape: f32[16,192], index: 7, kind: output, shape index: {}]  }
   0x1   :  { %13 = vsyncpa [#allocation6], 0 }
   0x2   :  { %14 = vsyncpa [#allocation9], 0 }
   0x3   :  { %15 = vsyncpa [#allocation4], 0  ;;  %s592_s24 = smov [#allocation5]   ;;  %s593_s26 = smov [#allocation2]  }
   0x4   :  { %s33_s25 = sshll.u32 %s592_s24, 4  ;;  %s21_s27 = sshll.u32 %s593_s26, 4  ;;  %s34_s25 = int_to_ptr.vmem [resolvable:$true] %s33_s25  ;;  %s642_s27 = int_to_ptr.vmem [resolvable:$true] %s21_s27 }
   0x5   :  { %s474_s30 = scalar_lea.hbm %s747_s1, 512 }
   0x6   :  { %p475_p0 = scmp.ne.s32.totalorder %s747_s1, %s474_s30  ;;  %p478_p1 = scmp.lt.u32.totalorder %s474_s30, %s747_s1 }
   0x8   :  { %p480_p2 = pnand %p478_p1, %p475_p0 }
   0xa   :  { %483 = shalt.err (!%p480_p2)
}
   0xb   :  { %s484_s12 = scalar_lea.vmem %s34_s25, 512  ;;  %p489_p4 = scmp.lt.s32.totalorder %s34_s25, %s34_s25 }
   0xc   :  { %p485_p3 = scmp.ne.s32.totalorder %s34_s25, %s484_s12  ;;  %p490_p5 = scmp.lt.s32.totalorder %s484_s12, %s484_s12 }
   0xe   :  { %p491_p6 = por %p490_p5, %p489_p4 }
  0x10   :  { %p492_p7 = pnand %p491_p6, %p485_p3 }
  0x12   :  { %495 = shalt.err (!%p492_p7)
}
  0x13   :  { %s594_s13 = smov 128   ;;  %s595_s14 = smov 8  }
  0x14   :  { %39 = dma.hbm_to_vmem [thread:$0]  %s747_s1, 512, %s34_s25, [#allocation6], %s594_s13, %s594_s13, %s595_s14  }
  0x15   :  { %s496_s19 = scalar_lea.hbm %s746_s0, 256 }
  0x16   :  { %p497_p8 = scmp.ne.s32.totalorder %s746_s0, %s496_s19  ;;  %p500_p9 = scmp.lt.u32.totalorder %s496_s19, %s746_s0 }
  0x18   :  { %p502_p10 = pnand %p500_p9, %p497_p8 }
  0x1a   :  { %505 = shalt.err (!%p502_p10)
}
  0x1b   :  { %s506_s24 = scalar_lea.vmem %s642_s27, 256  ;;  %p511_p12 = scmp.lt.s32.totalorder %s642_s27, %s642_s27 }
  0x1c   :  { %p507_p11 = scmp.ne.s32.totalorder %s642_s27, %s506_s24  ;;  %p512_p13 = scmp.lt.s32.totalorder %s506_s24, %s506_s24 }
  0x1e   :  { %p513_p0 = por %p512_p13, %p511_p12 }
  0x20   :  { %p514_p1 = pnand %p513_p0, %p507_p11 }
  0x22   :  { %517 = shalt.err (!%p514_p1)
}
  0x23   :  { %27 = dma.hbm_to_vmem [thread:$0]  %s746_s0, 256, %s642_s27, [#allocation3], %s594_s13, %s594_s13, %s595_s14  }
  0x24   :  { %s596_s26 = smov [#allocation7]   ;;  %s597_s29 = smov [#allocation8]  }
  0x25   :  { %s47_s28 = sshll.u32 %s596_s26, 4  ;;  %s61_s30 = sshll.u32 %s597_s29, 4  ;;  %s48_s28 = int_to_ptr.vmem [resolvable:$true] %s47_s28  ;;  %s679_s30 = int_to_ptr.vmem [resolvable:$true] %s61_s30 }
  0x26   :  { %s518_s10 = scalar_lea.hbm %s749_s3, 512 }
  0x27   :  { %p519_p2 = scmp.ne.s32.totalorder %s749_s3, %s518_s10  ;;  %p522_p3 = scmp.lt.u32.totalorder %s518_s10, %s749_s3 }
  0x29   :  { %p524_p4 = pnand %p522_p3, %p519_p2 }
  0x2b   :  { %527 = shalt.err (!%p524_p4)
}
  0x2c   :  { %s528_s0 = scalar_lea.vmem %s48_s28, 512  ;;  %p533_p6 = scmp.lt.s32.totalorder %s48_s28, %s48_s28 }
  0x2d   :  { %p529_p5 = scmp.ne.s32.totalorder %s48_s28, %s528_s0  ;;  %p534_p7 = scmp.lt.s32.totalorder %s528_s0, %s528_s0 }
  0x2f   :  { %p535_p8 = por %p534_p7, %p533_p6 }
  0x31   :  { %p536_p9 = pnand %p535_p8, %p529_p5 }
  0x33   :  { %539 = shalt.err (!%p536_p9)
}
  0x34   :  { %53 = dma.hbm_to_vmem [thread:$0]  %s749_s3, 512, %s48_s28, [#allocation6], %s594_s13, %s594_s13, %s595_s14  }
  0x35   :  { %s540_s20 = scalar_lea.hbm %s751_s5, 1024 }
  0x36   :  { %p541_p10 = scmp.ne.s32.totalorder %s751_s5, %s540_s20  ;;  %p544_p11 = scmp.lt.u32.totalorder %s540_s20, %s751_s5 }
  0x38   :  { %p546_p12 = pnand %p544_p11, %p541_p10 }
  0x3a   :  { %549 = shalt.err (!%p546_p12)
}
  0x3b   :  { %s550_s1 = scalar_lea.vmem %s679_s30, 1024  ;;  %p555_p0 = scmp.lt.s32.totalorder %s679_s30, %s679_s30 }
  0x3c   :  { %p551_p13 = scmp.ne.s32.totalorder %s679_s30, %s550_s1  ;;  %p556_p1 = scmp.lt.s32.totalorder %s550_s1, %s550_s1 }
  0x3e   :  { %p557_p2 = por %p556_p1, %p555_p0 }
  0x40   :  { %p558_p3 = pnand %p557_p2, %p551_p13 }
  0x42   :  { %561 = shalt.err (!%p558_p3)
}
  0x43   :  { %s598_s3 = smov 256   ;;  %s599_s13 = smov 16  }
  0x44   :  { %67 = dma.hbm_to_vmem [thread:$0]  %s751_s5, 1024, %s679_s30, [#allocation9], %s598_s3, %s598_s3, %s599_s13  }
  0x45   :  { %584 = dma.done.wait [#allocation3], 256  }
  0x46   :  { %585 = vsyncadd [#allocation3], 4294967040 }
  0x47   :  { %586 = dma.done.wait [#allocation6], 1024  }
  0x48   :  { %587 = vsyncadd [#allocation6], 4294966272 }
  0x49   :  { %588 = dma.done.wait [#allocation9], 1024  }
  0x4a   :  { %589 = vsyncadd [#allocation9], 4294966272  ;;  %vm95_vm0 = vcmask 261120   ;;  %v84_v0 = vld [vmem:[#allocation5] sm:$0xff]  ;;  %v85_v1 = vld [vmem:[#allocation5 + $0x8] sm:$0xff]  ;;  %v600_v33 = vmov 0.0   ;;  %v281_v39 = vlaneseq }
  0x4b   :  { %v86_v2 = vld [vmem:[#allocation5 + $0x10] sm:$0xff]  ;;  %v440_v3 = vpack.c.bf16 %v85_v1, %v84_v0  ;;  %v87_v4 = vld [vmem:[#allocation5 + $0x18] sm:$0xff]  ;;  %v179_v7 = vld [vmem:[#allocation7] sm:$0xff]  ;;  %361 = vmatprep.mubr.f32.mxu0 %v600_v33  ;;  %vm375_vm1 = vcmask 523264  }
  0x4c   :  { %v82_v5 = vld [vmem:[#allocation2] sm:$0xff]  ;;  %v444_v6 = vpack.c.bf16 %v87_v4, %v86_v2  ;;  %v180_v8 = vld [vmem:[#allocation7 + $0x8] sm:$0xff]  ;;  %v83_v10 = vld [vmem:[#allocation2 + $0x8] sm:$0xff]  ;;  %v282_v40 = vshrl.u32 %v281_v39, 7 }
  0x4d   :  { %426 = vmatprep.mubr.msk.f32.mxu1 %vm95_vm0, %v82_v5  ;;  %441 = vmatprep.subr.bf16.mxu1 %v440_v3  ;;  %v448_v9 = vpack.c.bf16 %v180_v8, %v179_v7  ;;  %v181_v11 = vld [vmem:[#allocation7 + $0x10] sm:$0xff]  ;;  %v182_v12 = vld [vmem:[#allocation7 + $0x18] sm:$0xff]  ;;  %v272_v14 = vld [vmem:[#allocation8 + $0x8] sm:$0xff] }
  0x4e   :  { %443 = vmatpush3.bf16.msra.mxu1 %v440_v3  ;;  %v452_v13 = vpack.c.bf16 %v182_v12, %v181_v11  ;;  %v274_v15 = vld [vmem:[#allocation8 + $0x18] sm:$0xff]  ;;  %v271_v16 = vld [vmem:[#allocation8] sm:$0xff]  ;;  %v273_v18 = vld [vmem:[#allocation8 + $0x10] sm:$0xff]  ;;  %v283_v41 = vsub.s32 0, %v282_v40  ;;  %v287_v43 = vsub.s32 1, %v282_v40 }
  0x4f   :  { %445 = vmatprep.subr.bf16.mxu1 %v444_v6  ;;  %v456_v17 = vpack.c.bf16 %v274_v15, %v272_v14  ;;  %v458_v19 = vpack.c.bf16 %v273_v18, %v271_v16  ;;  %v398_v20 = vld [vmem:[%s748_s2] ss:$0 sm:$0xff]  ;;  %v276_v27 = vld [vmem:[#allocation8 + $0x28] sm:$0xff]  ;;  %v278_v28 = vld [vmem:[#allocation8 + $0x38] sm:$0xff] }
  0x50   :  { %v460_v29 = vpack.c.bf16 %v278_v28, %v276_v27  ;;  %v275_v30 = vld [vmem:[#allocation8 + $0x20] sm:$0xff]  ;;  %v277_v31 = vld [vmem:[#allocation8 + $0x30] sm:$0xff] }
  0x51   :  { %457 = vmatprep.subr.bf16.mxu0 %v456_v17  ;;  %v462_v32 = vpack.c.bf16 %v277_v31, %v275_v30  ;;  %v401_v34 = vld [vmem:[%s750_s4] ss:$0 sm:$0xff]  ;;  %s601_s4 = smov [#allocation10]  }
  0x52   :  { %447 = vmatpush3.bf16.msra.mxu1 %v444_v6  ;;  %459 = vmatpush1.bf16.msra.mxu0 %v458_v19  ;;  %v279_v42 = vld [vmem:[%s752_s6] sm:$0x3]  ;;  %s384_s8 = sshll.u32 %s601_s4, 4  ;;  %s385_s8 = int_to_ptr.vmem [resolvable:$true] %s384_s8 }
  0x53   :  { %449 = vmatprep.subr.bf16.mxu1 %v448_v9  ;;  %461 = vmatprep.subr.bf16.mxu0 %v460_v29  ;;  %v284_v44 = vrot.slane %v279_v42, %v283_v41  ;;  %v288_v45 = vrot.slane %v279_v42, %v287_v43  ;;  %s562_s6 = scalar_lea.vmem %s385_s8, 512  ;;  %p567_p5 = scmp.lt.s32.totalorder %s385_s8, %s385_s8 }
  0x54   :  { %p563_p4 = scmp.ne.s32.totalorder %s385_s8, %s562_s6  ;;  %p568_p6 = scmp.lt.s32.totalorder %s562_s6, %s562_s6 }
  0x55   :  { %427 = vmatmul.mubr.msk.f32.vlgmr.msra.gmra.mrb[0].mxu1 %vm95_vm0, %v83_v10 }
  0x56   :  { %451 = vmatpush3.bf16.msra.mxu1 %v448_v9  ;;  %463 = vmatpush1.bf16.msra.mxu0 %v462_v32  ;;  %p569_p7 = por %p568_p6, %p567_p5 }
  0x57   :  { %453 = vmatprep.subr.bf16.mxu1 %v452_v13 }
  0x58   :  { %p570_p8 = pnand %p569_p7, %p563_p4 }
  0x5a   :  { %455 = vmatpush3.bf16.msra.mxu1 %v452_v13 }
 0x128   :  { %v428_v21 = vpop.f32.mrb[0].mxu1 }
 0x129   :  { %v174_v22 = vadd.f32 %v428_v21, %v398_v20  ;;  %v168_v23 = vpop.f32.mrb[1].mxu1 }
 0x12a   :  { %v169_v24 = vadd.f32 %v398_v20, %v168_v23 }
 0x12b   :  { %v178_v26 = vmax.f32 %v174_v22, 0.0 }
 0x12c   :  { %v177_v25 = vmax.f32 %v169_v24, 0.0 }
 0x12e   :  { %437 = vmatprep.mubr.msk.f32.mxu1 %vm95_vm0, %v177_v25 }
 0x12f   :  { %438 = vmatmul.mubr.msk.f32.vlgmr.msra.gmra.mrb[2].mxu1 %vm95_vm0, %v178_v26 }
 0x202   :  { %v439_v35 = vpop.f32.mrb[2].mxu1 }
 0x203   :  { %v262_v36 = vpop.f32.mrb[3].mxu1  ;;  %v268_v38 = vadd.f32 %v439_v35, %v401_v34 }
 0x204   :  { %v263_v37 = vadd.f32 %v401_v34, %v262_v36 }
 0x206   :  { %404 = vmatmul.mubr.msk.f32.vlgmr.msra.gmra.mrb[0].mxu0 %vm95_vm0, %v263_v37 }
 0x207   :  { %367 = vmatprep.mubr.f32.mxu0 %v600_v33 }
 0x20a   :  { %405 = vmatmul.mubr.msk.f32.gmra.mrb[2].mxu0 %vm95_vm0, %v268_v38 }
 0x2d9   :  { %v363_v46 = vpop.f32.mrb[0].mxu0 }
 0x2da   :  { %v364_v47 = vadd.f32 %v363_v46, %v284_v44  ;;  %v365_v48 = vpop.f32.mrb[1].mxu0 }
 0x2db   :  { %v366_v49 = vadd.f32 %v365_v48, %v288_v45 }
 0x2dc   :  { %374 = vst [vmem:[#allocation10] sm:$0xff] %v364_v47 }
 0x2dd   :  { %376 = vst.msk [vmem:[#allocation10 + $0x8] sm:$0xff] %vm375_vm1, %v366_v49  ;;  %v369_v50 = vpop.f32.mrb[2].mxu0 }
 0x2de   :  { %v370_v51 = vadd.f32 %v369_v50, %v284_v44  ;;  %v371_v52 = vpop.f32.mrb[3].mxu0 }
 0x2df   :  { %v372_v53 = vadd.f32 %v371_v52, %v288_v45 }
 0x2e0   :  { %377 = vst [vmem:[#allocation10 + $0x10] sm:$0xff] %v370_v51 }
 0x2e1   :  { %378 = vst.msk [vmem:[#allocation10 + $0x18] sm:$0xff] %vm375_vm1, %v372_v53 }
 0x2e2   :  { %573 = shalt.err (!%p570_p8)
}
 0x2e3   :  { %s574_s11 = scalar_lea.hbm %s753_s7, 512 }
 0x2e4   :  { %p575_p9 = scmp.ne.s32.totalorder %s753_s7, %s574_s11  ;;  %p578_p10 = scmp.lt.u32.totalorder %s574_s11, %s753_s7 }
 0x2e6   :  { %p580_p11 = pnand %p578_p10, %p575_p9 }
 0x2e8   :  { %583 = shalt.err (!%p580_p11)
}
 0x2e9   :  { %390 = dma.vmem_to_hbm [thread:$0]  %s385_s8, 512, %s753_s7, [#allocation4], %s598_s3, %s598_s3, %s599_s13  }
 0x2ea   :  { %590 = dma.done.wait [#allocation4], 512  }
 0x2eb   :  { %591 = vsyncadd [#allocation4], 4294966784 }
 0x2ec   :  { %394 = vsyncpa [#allocation3], 1 }
 0x2ed   :  { %395 = vsyncpa [#allocation6], 1 }
 0x2ee   :  { %396 = vsyncpa [#allocation9], 1 }
 0x2ef   :  { %397 = vsyncpa [#allocation4], 1 }

</bundles_post_ra>
